<compile_context>
chip_gen: v7x
topology: tpu7x:2x2x1
jax: 0.10.0
libtpu: 0.0.40
codegen_flags: <defaults>
</compile_context>

<pallas_src>
import jax
import jax.numpy as jnp
from jax.experimental import pallas as pl
from jax.experimental.pallas import tpu as pltpu


def _make_mlp_kernel(mxu_dtype):
    def mlp_kernel(x_ref, w1T_ref, b1_ref, w2T_ref, b2_ref, oT_ref):
        # x: (TB, IN)  w1T: (H, IN)  b1: (H,1)  w2T: (OUT, H)  b2: (OUT,1)
        # oT: (OUT, TB)   -- batch on the 128-lane axis for all compute/stores.
        xm = x_ref[...].astype(mxu_dtype)
        w1m = w1T_ref[...].astype(mxu_dtype)
        # (H, IN) contracted with (TB, IN) on IN  ->  (H, TB); f32 accumulate.
        h = jax.lax.dot_general(
            w1m, xm,
            dimension_numbers=(((1,), (1,)), ((), ())),
            preferred_element_type=jnp.float32)
        h = jnp.maximum(h + b1_ref[...], 0.0)          # bias + ReLU on VPU (f32)
        # (OUT, H) @ (H, TB) -> (OUT, TB); f32 accumulate.
        y = jnp.dot(w2T_ref[...].astype(mxu_dtype), h.astype(mxu_dtype),
                    preferred_element_type=jnp.float32)
        y = y + b2_ref[...]
        # Exact sigmoid: exp on the EUP; divide is off the critical (DMA) path.
        oT_ref[...] = (1.0 / (1.0 + jnp.exp(-y))).astype(oT_ref.dtype)
    return mlp_kernel


def _pick_batch_tile(B, block_b):
    """Batch tile: multiple of 128, as large as requested, but with >= 2 grid
    steps whenever the (padded) batch allows it (v7x megacore sharding)."""
    bp_min = pl.cdiv(B, 128) * 128                 # batch rounded up to lane width
    tb = min(max(128, (block_b // 128) * 128), bp_min)
    if bp_min >= 256:
        tb = min(tb, max(128, (bp_min // 2) // 128 * 128))
    return tb


def neural_network_forward(x, w1, b1, w2, b2, *, block_b=4096,
                           mxu_dtype=jnp.float32, out_transposed=False):
    """Fused MLP forward:  sigmoid(relu(x @ w1 + b1) @ w2 + b2).

    x : (B, IN)   w1: (IN, H)  b1: (1, H)   w2: (H, OUT)  b2: (1, OUT)
    Returns (B, OUT) float32, or (OUT, B) if out_transposed=True (avoids one
    extra read+write pass over the output for consumers that accept it).

    block_b:   requested batch tile (rounded to a multiple of 128).
    mxu_dtype: dtype the matmul operands are cast to *inside* the kernel
               (bfloat16 is useful on v5e's bf16 MXU); accumulation stays f32.
    """
    B, IN = x.shape
    H = w1.shape[1]
    OUT = w2.shape[1]

    x = x.astype(jnp.float32)
    tb = _pick_batch_tile(B, block_b)
    bp = pl.cdiv(B, tb) * tb
    # Pad only when the batch doesn't divide the tile (no transpose copy; the
    # common divisible case touches x exactly once, inside the kernel DMA).
    x_in = x if bp == B else jnp.pad(x, ((0, bp - B), (0, 0)))

    w1T = jnp.asarray(w1, jnp.float32).T            # (H, IN)   -- tiny, resident
    w2T = jnp.asarray(w2, jnp.float32).T            # (OUT, H)  -- tiny, resident
    b1c = jnp.asarray(b1, jnp.float32).reshape(H, 1)
    b2c = jnp.asarray(b2, jnp.float32).reshape(OUT, 1)

    cost = pl.CostEstimate(
        flops=2 * bp * (IN * H + H * OUT),
        transcendentals=bp * OUT,
        bytes_accessed=4 * (bp * IN + bp * OUT + IN * H + H + H * OUT + OUT),
    )

    outT = pl.pallas_call(
        _make_mlp_kernel(mxu_dtype),
        out_shape=jax.ShapeDtypeStruct((OUT, bp), jnp.float32),
        grid=(bp // tb,),
        in_specs=[
            pl.BlockSpec((tb, IN), lambda i: (i, 0)),   # x tile, natural layout, pipelined
            pl.BlockSpec((H, IN), lambda i: (0, 0)),    # W1T resident in VMEM
            pl.BlockSpec((H, 1), lambda i: (0, 0)),     # b1  resident
            pl.BlockSpec((OUT, H), lambda i: (0, 0)),   # W2T resident
            pl.BlockSpec((OUT, 1), lambda i: (0, 0)),   # b2  resident
        ],
        out_specs=pl.BlockSpec((OUT, tb), lambda i: (0, i)),  # lane-dense stores
        compiler_params=pltpu.CompilerParams(
            dimension_semantics=("parallel",),          # megacore split on v7x
        ),
        cost_estimate=cost,
    )(x_in, w1T, b1c, w2T, b2c)

    if out_transposed:
        return outT if bp == B else outT[:, :B]
    return outT[:, :B].T


def init_params(key, in_features, hidden, out_features):
    """Deterministic init mimicking PyTorch nn.Linear default U(-k, k), k=1/sqrt(fan_in)."""
    k1, k2, k3, k4 = jax.random.split(key, 4)
    bound1 = 1.0 / jnp.sqrt(in_features)
    bound2 = 1.0 / jnp.sqrt(hidden)
    # stored as (in, out) == transpose of PyTorch's (out, in) weight layout
    w1 = jax.random.uniform(k1, (in_features, hidden), jnp.float32, -bound1, bound1)
    b1 = jax.random.uniform(k2, (1, hidden), jnp.float32, -bound1, bound1)
    w2 = jax.random.uniform(k3, (hidden, out_features), jnp.float32, -bound2, bound2)
    b2 = jax.random.uniform(k4, (1, out_features), jnp.float32, -bound2, bound2)
    return w1, b1, w2, b2


if __name__ == "__main__":
    key = jax.random.PRNGKey(0)
    kx, kp = jax.random.split(key)

    B, IN, H, OUT = 256, 16, 32, 8
    x = jax.random.normal(kx, (B, IN), dtype=jnp.float32)
    w1, b1, w2, b2 = init_params(kp, IN, H, OUT)

    # Pure-JAX reference (highest-precision matmuls so the comparison is fair).
    hp = jax.lax.Precision.HIGHEST
    h_ref = jnp.maximum(jnp.dot(x, w1, precision=hp) + b1, 0.0)
    ref = jax.nn.sigmoid(jnp.dot(h_ref, w2, precision=hp) + b2)

    # Default path: f32 operands, natural x layout, (B, OUT) result.
    out = neural_network_forward(x, w1, b1, w2, b2)
    jax.block_until_ready(out)
    assert out.shape == (B, OUT)
    assert jnp.allclose(out, ref, atol=2e-3, rtol=2e-3)

    # Transposed-output path (skips the wrapper-side transpose pass).
    outT = neural_network_forward(x, w1, b1, w2, b2, out_transposed=True)
    jax.block_until_ready(outT)
    assert outT.shape == (OUT, B)
    assert jnp.allclose(outT.T, ref, atol=2e-3, rtol=2e-3)

    # Ragged batch (exercises batch padding + slice-back only when needed).
    out_ragged = neural_network_forward(x[:200], w1, b1, w2, b2)
    jax.block_until_ready(out_ragged)
    assert out_ragged.shape == (200, OUT)
    assert jnp.allclose(out_ragged, ref[:200], atol=2e-3, rtol=2e-3)

    # In-kernel bf16 matmul operands (v5e bf16 MXU), f32 accumulate + epilogue.
    out_bf16 = neural_network_forward(x, w1, b1, w2, b2, mxu_dtype=jnp.bfloat16)
    jax.block_until_ready(out_bf16)
    assert jnp.allclose(out_bf16, ref, atol=3e-2, rtol=3e-2)

    print("KERNEL_OK")
</pallas_src>

<mosaic_0001>
module attributes {stable_mosaic.version = 11 : i64} {
  func.func @mlp_kernel(%arg0: i32, %arg1: memref<128x16xf32, #tpu.memory_space<vmem>>, %arg2: memref<32x16xf32, #tpu.memory_space<vmem>>, %arg3: memref<32x1xf32, #tpu.memory_space<vmem>>, %arg4: memref<8x32xf32, #tpu.memory_space<vmem>>, %arg5: memref<8x1xf32, #tpu.memory_space<vmem>>, %arg6: memref<8x128xf32, #tpu.memory_space<vmem>>) attributes {dimension_semantics = [#tpu.dimension_semantics<parallel>], iteration_bounds = array<i64: 2>, scalar_prefetch = 0 : i64, scratch_operands = 0 : i64, tpu.core_type = #tpu.core_type<tc>, window_params = [{transform_indices = @transform_0, window_bounds = array<i64: 128, 16>}, {pipeline_mode = #tpu.pipeline_mode<synchronous>, transform_indices = @transform_1, window_bounds = array<i64: 32, 16>}, {pipeline_mode = #tpu.pipeline_mode<synchronous>, transform_indices = @transform_2, window_bounds = array<i64: 32, 1>}, {pipeline_mode = #tpu.pipeline_mode<synchronous>, transform_indices = @transform_3, window_bounds = array<i64: 8, 32>}, {pipeline_mode = #tpu.pipeline_mode<synchronous>, transform_indices = @transform_4, window_bounds = array<i64: 8, 1>}, {transform_indices = @transform_5, window_bounds = array<i64: 8, 128>}]} {
    %c0 = arith.constant 0 : index
    %c0_0 = arith.constant 0 : index
    %0 = vector.load %arg1[%c0, %c0_0] : memref<128x16xf32, #tpu.memory_space<vmem>>, vector<128x16xf32>
    %c0_1 = arith.constant 0 : index
    %c0_2 = arith.constant 0 : index
    %1 = vector.load %arg2[%c0_1, %c0_2] : memref<32x16xf32, #tpu.memory_space<vmem>>, vector<32x16xf32>
    %cst = arith.constant dense<0.000000e+00> : vector<32x128xf32>
    %2 = tpu.matmul %1, %0, %cst {dimension_numbers = #tpu.dot_dimension_numbers<[1], [1], [0], [0], [0, 0, 1, 0], [], []>} : vector<32x16xf32>, vector<128x16xf32>, vector<32x128xf32> -> vector<32x128xf32>
    %c0_3 = arith.constant 0 : index
    %c0_4 = arith.constant 0 : index
    %3 = vector.load %arg3[%c0_3, %c0_4] : memref<32x1xf32, #tpu.memory_space<vmem>>, vector<32x1xf32>
    %4 = vector.broadcast %3 : vector<32x1xf32> to vector<32x128xf32>
    %5 = arith.addf %2, %4 : vector<32x128xf32>
    %cst_5 = arith.constant 0.000000e+00 : f32
    %6 = vector.broadcast %cst_5 : f32 to vector<32x128xf32>
    %7 = arith.maximumf %5, %6 : vector<32x128xf32>
    %c0_6 = arith.constant 0 : index
    %c0_7 = arith.constant 0 : index
    %8 = vector.load %arg4[%c0_6, %c0_7] : memref<8x32xf32, #tpu.memory_space<vmem>>, vector<8x32xf32>
    %cst_8 = arith.constant dense<0.000000e+00> : vector<8x128xf32>
    %9 = tpu.matmul %8, %7, %cst_8 {dimension_numbers = #tpu.dot_dimension_numbers<[1], [0], [0], [1], [0, 0, 1, 1], [], []>} : vector<8x32xf32>, vector<32x128xf32>, vector<8x128xf32> -> vector<8x128xf32>
    %c0_9 = arith.constant 0 : index
    %c0_10 = arith.constant 0 : index
    %10 = vector.load %arg5[%c0_9, %c0_10] : memref<8x1xf32, #tpu.memory_space<vmem>>, vector<8x1xf32>
    %11 = vector.broadcast %10 : vector<8x1xf32> to vector<8x128xf32>
    %12 = arith.addf %9, %11 : vector<8x128xf32>
    %cst_11 = arith.constant 0.000000e+00 : f32
    %13 = vector.broadcast %cst_11 : f32 to vector<8x128xf32>
    %14 = arith.subf %13, %12 : vector<8x128xf32>
    %15 = math.exp %14 : vector<8x128xf32>
    %cst_12 = arith.constant 1.000000e+00 : f32
    %16 = vector.broadcast %cst_12 : f32 to vector<8x128xf32>
    %17 = arith.addf %16, %15 : vector<8x128xf32>
    %cst_13 = arith.constant 1.000000e+00 : f32
    %18 = vector.broadcast %cst_13 : f32 to vector<8x128xf32>
    %19 = arith.divf %18, %17 : vector<8x128xf32>
    %c0_14 = arith.constant 0 : index
    %c0_15 = arith.constant 0 : index
    %20 = vector.load %arg6[%c0_14, %c0_15] : memref<8x128xf32, #tpu.memory_space<vmem>>, vector<8x128xf32>
    tpu.vector_store %arg6[%c0_14, %c0_15], %19 {strides = array<i32>} : memref<8x128xf32, #tpu.memory_space<vmem>>, vector<8x128xf32>,
    return
  }
  func.func @transform_0(%arg0: i32) -> (i32, i32) {
    %c0_i32 = arith.constant 0 : i32
    %c0_i32_0 = arith.constant 0 : i32
    return %arg0, %c0_i32 : i32, i32
  }
  func.func @transform_1(%arg0: i32) -> (i32, i32) {
    %c0_i32 = arith.constant 0 : i32
    %c0_i32_0 = arith.constant 0 : i32
    %c0_i32_1 = arith.constant 0 : i32
    return %c0_i32, %c0_i32_0 : i32, i32
  }
  func.func @transform_2(%arg0: i32) -> (i32, i32) {
    %c0_i32 = arith.constant 0 : i32
    %c0_i32_0 = arith.constant 0 : i32
    %c0_i32_1 = arith.constant 0 : i32
    return %c0_i32, %c0_i32_0 : i32, i32
  }
  func.func @transform_3(%arg0: i32) -> (i32, i32) {
    %c0_i32 = arith.constant 0 : i32
    %c0_i32_0 = arith.constant 0 : i32
    %c0_i32_1 = arith.constant 0 : i32
    return %c0_i32, %c0_i32_0 : i32, i32
  }
  func.func @transform_4(%arg0: i32) -> (i32, i32) {
    %c0_i32 = arith.constant 0 : i32
    %c0_i32_0 = arith.constant 0 : i32
    %c0_i32_1 = arith.constant 0 : i32
    return %c0_i32, %c0_i32_0 : i32, i32
  }
  func.func @transform_5(%arg0: i32) -> (i32, i32) {
    %c0_i32 = arith.constant 0 : i32
    %c0_i32_0 = arith.constant 0 : i32
    return %c0_i32, %arg0 : i32, i32
  }
}

</mosaic_0001>

<bundles_post_ra>
// kernel: tpu_custom_call.1
= control target key start
LH: loop header
LB: loop body
LE: loop exit
PB: predicated region body
PF: predicated region fallthrough
CT: control target
= control target key end

     0   :  { %10 = vsyncpa [#allocation3], 0  ;;  %s1077_s0 = inlined_call_operand.vmem [shape: f32[256,16], index: 0, kind: input, shape index: {}]   ;;  %s1078_s1 = inlined_call_operand.vmem [shape: f32[32,16], index: 1, kind: input, shape index: {}]   ;;  %s1079_s2 = inlined_call_operand.vmem [shape: f32[32,1], index: 2, kind: input, shape index: {}]   ;;  %s1080_s3 = inlined_call_operand.vmem [shape: f32[8,32], index: 3, kind: input, shape index: {}]   ;;  %s1081_s4 = inlined_call_operand.vmem [shape: f32[8,1], index: 4, kind: input, shape index: {}]   ;;  %s1082_s5 = inlined_call_operand.hbm [shape: f32[8,256], index: 5, kind: output, shape index: {}]  }
   0x1   :  { %12 = vsyncpa [#allocation3 + $0x1], 0  ;;  %s888_s18 = smov 0   ;;  %s890_s19 = smov 0  }
   0x2   :  { %s892_s20 = smov 0   ;;  %s894_s21 = smov 0  }
   0x3 LB: > { %s909_s22 = sadd.s32 4294967295, %s851_s21   ;;  %s580_s23 = sadd.s32 4294967294, %s851_s21   ;;  %s851_s21 = sphi %s894_s21, %s1090_s21   ;;  %s847_s20 = sphi %s892_s20, %s1089_s20   ;;  %s843_s19 = sphi %s890_s19, %s1088_s19   ;;  %s839_s18 = sphi %s888_s18, %s1087_s18  }
   0x4   : > { %s913_s24 = sadd.s32 1, %s851_s21   ;;  %s135_s25 = sadd.s32 1, %s847_s20 }
   0x5   : > { %s132_s26 = ssub.s32 %s851_s21, %s913_s24  ;;  %p145_p0 = scmp.ne.s32.totalorder %s847_s20, %s843_s19 }
   0x6   : > { %p133_p1 = scmp.eq.s32.totalorder %s132_s26, 0  ;;  %p146_p2 = scmp.eq.s32.totalorder %s909_s22, 1 }
   0x7   : > { %p151_p3 = scmp.ne.s32.totalorder %s843_s19, %s839_s18  ;;  %p152_p4 = scmp.eq.s32.totalorder %s580_s23, 1 }
   0x8   : > { %s924_s27 = scalar_select %p133_p1, %s847_s20, %s135_s25  }
   0x9   : > { %p926_p5 = por %p146_p2, %p145_p0  ;;  %p930_p6 = por %p152_p4, %p151_p3 }
   0xa   : > { %p583_p7 = scmp.ge.s32.totalorder %s851_s21, 1  ;;  %p191_p8 = scmp.lt.s32.totalorder %s851_s21, 3 }
   0xc   : > { %p192_p9 = pnand %p583_p7, %p191_p8 }
   0xd   : > { %s585_s30 = sshll.u32 (!%p192_p9), %s909_s22, 4  ;;  %vm269_vm0 = vcmask (!%p192_p9), 130048   ;;  %v241_v0 = vld [vmem:[%s1078_s1] sm:$0xff] (!%p192_p9)  ;;  %v853_v1 = vmov (!%p192_p9), 0   ;;  %v247_v3 = vld [vmem:[%s1079_s2 + $0x10] sm:$0xff] (!%p192_p9)  ;;  %v246_v4 = vld [vmem:[%s1079_s2 + $0x8] sm:$0xff] (!%p192_p9) }
   0xe   : > { %195 = sbr.rel (%p192_p9) target bundleno = 573 (0x23d), region = 40  ;;  %p220_p10 = scmp.lt.s32.totalorder (!%p192_p9), %s585_s30, 31  ;;  %669 = vmatprep.mubr.msk.f32.mxu0 (!%p192_p9), %vm269_vm0, %v241_v0  ;;  %783 = vset.pattern.permute.xlu0 (!%p192_p9), %v853_v1  ;;  %v245_v2 = vld [vmem:[%s1079_s2] sm:$0xff] (!%p192_p9)  ;;  %v248_v5 = vld [vmem:[%s1079_s2 + $0x18] sm:$0xff] (!%p192_p9)  ;;  %vm960_vm1 = vmpackc.low (!%p192_p9), %vm269_vm0, %vm269_vm0  ;;  %v854_v35 = vmov (!%p192_p9), 0.0|0.0   ;;  %vm855_vm2 = vmmov (!%p192_p9), 0  }
   0xf   : > { %251 = vperm.xlu0 (!%p192_p9), %783, %v245_v2   ;;  %784 = vset.pattern.permute.xlu1 (!%p192_p9), %v853_v1  ;;  %v420_v7 = vld [vmem:[%s1081_s4] sm:$0xff] (!%p192_p9)  ;;  %v242_v32 = vld [vmem:[%s1078_s1 + $0x8] sm:$0xff] (!%p192_p9)  ;;  %v243_v33 = vld [vmem:[%s1078_s1 + $0x10] sm:$0xff] (!%p192_p9)  ;;  %v856_v36 = vmov (!%p192_p9), 0.0   ;;  %vm426_vm3 = vcmask (!%p192_p9), 261120   ;;  %s216_s14 = sand.u32 (!%p192_p9), 1, %s843_s19  }
  0x10   : > { %261 = vperm.xlu1 (!%p192_p9), %784, %v247_v3   ;;  %v244_v34 = vld [vmem:[%s1078_s1 + $0x18] sm:$0xff] (!%p192_p9)  ;;  %734 = vmatprep.subr.bf16.mxu1 (!%p192_p9), %v854_v35  ;;  %v419_v55 = vld [vmem:[%s1080_s3] sm:$0xff] (!%p192_p9)  ;;  %s584_s15 = sshll.u32 (!%p192_p9), %s216_s14, 3  ;;  %s508_s6 = scalar_lea.sflag (!%p192_p9), [#allocation3], %s216_s14 }
  0x11   : > { %683 = vmatprep.mubr.msk.f32.mxu1 (!%p192_p9), %vm855_vm2, %v856_v36  ;;  %s218_s17 = scalar_lea.vmem (!%p192_p9), [#allocation2], %s584_s15 }
  0x12   : > { %s521_s23 = sshll.u32 (!%p192_p9), %s218_s17, 4  ;;  %s1037_s23 = int_to_ptr.vmem [resolvable:$true] %s521_s23 }
  0x13   : > { %256 = vperm.xlu0 (!%p192_p9), %783, %v246_v4   ;;  %s789_s7 = scalar_lea.vmem (!%p192_p9), %s1037_s23, 128 }
  0x14   : > { %266 = vperm.xlu1 (!%p192_p9), %784, %v248_v5   ;;  %p790_p11 = scmp.ne.s32.totalorder (!%p192_p9), %s1037_s23, %s789_s7 }
  0x15   : > { %s1092_s30 = smov (!%p220_p10, %s585_s30), 31 }
  0x16   : > { %s586_s16 = sshll.u32 %s1092_s30, 3  ;;  %p791_p12 = pnand %p790_p11, %p926_p5 }
  0x17   : > { %s956_s25 = scalar_lea.vmem %s1077_s0, %s586_s16  ;;  %423 = vperm.xlu0 %783, %v420_v7   ;;  %s609_s16 = sshll.u32 %s909_s22, 7 }
  0x18   : > { %v225_v8 = vld [vmem:[%s956_s25] sm:$0xff]  ;;  %v226_v9 = vld [vmem:[%s956_s25 + $0x8] sm:$0xff]  ;;  %v227_v10 = vld [vmem:[%s956_s25 + $0x10] sm:$0xff]  ;;  %s1035_s30 = scalar_lea.hbm %s1082_s5, %s609_s16  ;;  %p792_p13 = pneg %p791_p12 }
  0x19   : > { %v686_v11 = vpack.c.bf16 %v226_v9, %v225_v8  ;;  %v228_v12 = vld [vmem:[%s956_s25 + $0x18] sm:$0xff]  ;;  %v229_v14 = vld [vmem:[%s956_s25 + $0x20] sm:$0xff]  ;;  %v230_v15 = vld [vmem:[%s956_s25 + $0x28] sm:$0xff]  ;;  %s857_s22 = smov [#allocation2]  }
  0x1a   : > { %v692_v13 = vpack.c.bf16 %v228_v12, %v227_v10  ;;  %v698_v16 = vpack.c.bf16 %v230_v15, %v229_v14  ;;  %v231_v17 = vld [vmem:[%s956_s25 + $0x30] sm:$0xff]  ;;  %v232_v18 = vld [vmem:[%s956_s25 + $0x38] sm:$0xff]  ;;  %v233_v20 = vld [vmem:[%s956_s25 + $0x40] sm:$0xff]  ;;  %s793_s8 = sshll.u32 %s857_s22, 4  ;;  %s794_s8 = int_to_ptr.vmem [resolvable:$false] %s793_s8 }
  0x1b   : > { %688 = vmatprep.subr.msk.bf16.mxu0 %vm960_vm1, %v686_v11  ;;  %v704_v19 = vpack.c.bf16 %v232_v18, %v231_v17  ;;  %v234_v21 = vld [vmem:[%s956_s25 + $0x48] sm:$0xff]  ;;  %v235_v23 = vld [vmem:[%s956_s25 + $0x50] sm:$0xff]  ;;  %v236_v24 = vld [vmem:[%s956_s25 + $0x58] sm:$0xff]  ;;  %s795_s9 = scalar_lea.vmem %s794_s8, 256  ;;  %p796_p0 = scmp.lt.s32.totalorder %s1037_s23, %s794_s8 }
  0x1c   : > { %691 = vmatpush3.bf16.xpose.msk.msra.mxu0 %vm960_vm1, %v686_v11  ;;  %v710_v22 = vpack.c.bf16 %v234_v21, %v233_v20  ;;  %v716_v25 = vpack.c.bf16 %v236_v24, %v235_v23  ;;  %v237_v26 = vld [vmem:[%s956_s25 + $0x60] sm:$0xff]  ;;  %v238_v27 = vld [vmem:[%s956_s25 + $0x68] sm:$0xff]  ;;  %v239_v29 = vld [vmem:[%s956_s25 + $0x70] sm:$0xff]  ;;  %p797_p1 = scmp.lt.s32.totalorder %s795_s9, %s789_s7 }
  0x1d   : > { %694 = vmatprep.subr.msk.bf16.mxu0 %vm960_vm1, %v692_v13  ;;  %v722_v28 = vpack.c.bf16 %v238_v27, %v237_v26  ;;  %v240_v30 = vld [vmem:[%s956_s25 + $0x78] sm:$0xff] }
  0x1e   : > { %v728_v31 = vpack.c.bf16 %v240_v30, %v239_v29  ;;  %p798_p2 = por %p797_p1, %p796_p0 }
  0x20   : > { %p799_p3 = pnand %p798_p2, %p792_p13 }
  0x24   : > { %697 = vmatpush3.bf16.xpose.msk.msra.mxu0 %vm960_vm1, %v692_v13 }
  0x25   : > { %700 = vmatprep.subr.msk.bf16.mxu0 %vm960_vm1, %v698_v16 }
  0x2c   : > { %703 = vmatpush3.bf16.xpose.msk.msra.mxu0 %vm960_vm1, %v698_v16 }
  0x2d   : > { %706 = vmatprep.subr.msk.bf16.mxu0 %vm960_vm1, %v704_v19 }
  0x34   : > { %709 = vmatpush3.bf16.xpose.msk.msra.mxu0 %vm960_vm1, %v704_v19 }
  0x35   : > { %712 = vmatprep.subr.msk.bf16.mxu0 %vm960_vm1, %v710_v22 }
  0x3c   : > { %715 = vmatpush3.bf16.xpose.msk.msra.mxu0 %vm960_vm1, %v710_v22 }
  0x3d   : > { %718 = vmatprep.subr.msk.bf16.mxu0 %vm960_vm1, %v716_v25 }
  0x44   : > { %721 = vmatpush3.bf16.xpose.msk.msra.mxu0 %vm960_vm1, %v716_v25 }
  0x45   : > { %724 = vmatprep.subr.msk.bf16.mxu0 %vm960_vm1, %v722_v28 }
  0x4c   : > { %727 = vmatpush3.bf16.xpose.msk.msra.mxu0 %vm960_vm1, %v722_v28 }
  0x4d   : > { %730 = vmatprep.subr.msk.bf16.mxu0 %vm960_vm1, %v728_v31 }
  0x54   : > { %733 = vmatpush3.bf16.xpose.msk.msra.mxu0 %vm960_vm1, %v728_v31 }
  0x5b   : > { %670 = vmatmul.mubr.msk.f32.vlgmr.msra.gmra.mrb[0].mxu0 %vm269_vm0, %v242_v32 }
  0x5c   : > { %672 = vmatprep.mubr.msk.f32.mxu0 %vm269_vm0, %v243_v33 }
  0x5f   : > { %673 = vmatmul.mubr.msk.f32.gmra.mrb[2].mxu0 %vm269_vm0, %v244_v34 }
  0x8e   : > { %v252_v37 = vpop.permute.xlu0 %251 }
  0x8f   : > { %v262_v38 = vpop.permute.xlu1 %261 }
  0x92   : > { %v257_v39 = vpop.permute.xlu0 %256 }
  0x93   : > { %v267_v45 = vpop.permute.xlu1 %266 }
  0x96   : > { %v424_v56 = vpop.permute.xlu0 %423 }
 0x12e   : > { %v671_v40 = vpop.f32.mrb[0].mxu0 }
 0x12f   : > { %v402_v41 = vadd.f32 %v671_v40, %v257_v39  ;;  %v396_v42 = vpop.f32.mrb[1].mxu0 }
 0x130   : > { %v397_v43 = vadd.f32 %v396_v42, %v252_v37 }
 0x131   : > { %v416_v44 = vmax.f32 %v402_v41, 0.0 }
 0x132   : > { %v415_v46 = vmax.f32 %v397_v43, 0.0  ;;  %v674_v47 = vpop.f32.mrb[2].mxu0 }
 0x133   : > { %v412_v48 = vadd.f32 %v674_v47, %v267_v45  ;;  %v406_v49 = vpop.f32.mrb[3].mxu0 }
 0x134   : > { %v407_v50 = vadd.f32 %v406_v49, %v262_v38  ;;  %v735_v51 = vpack.c.bf16 %v416_v44, %v415_v46 }
 0x135   : > { %v418_v52 = vmax.f32 %v412_v48, 0.0 }
 0x136   : > { %v417_v53 = vmax.f32 %v407_v50, 0.0  ;;  %736 = vmatpush3.bf16.msra.mxu1 %v735_v51 }
 0x137   : > { %737 = vmatprep.subr.bf16.mxu1 %v854_v35 }
 0x138   : > { %v738_v54 = vpack.c.bf16 %v418_v52, %v417_v53 }
 0x13a   : > { %739 = vmatpush3.bf16.msra.mxu1 %v738_v54 }
 0x13d   : > { %684 = vmatmul.mubr.msk.f32.vlgmr.msra.gmra.mrb[0].mxu1 %vm426_vm3, %v419_v55 }
 0x210   : > { %v496_v57 = vpop.f32.mrb[0].mxu1 }
 0x211   : > { %v497_v58 = vadd.f32 %v496_v57, %v424_v56  ;;  %v685_v59 = vpop.f32.mrb[1].mxu1 }
 0x213   : > { %v500_v60 = vsub.f32 0.0, %v497_v58 }
 0x215   : > { %v501_v61 = vmul.f32 1.442695, %v500_v60 }
 0x217   : > { %785 = vpow2.f32 %v501_v61 }
 0x221   : > { %v786_v62 = vpop.eup %785 }
 0x222   : > { %v503_v63 = vadd.f32 1.0, %v786_v62 }
 0x224   : > { %787 = vrcp.f32 %v503_v63 }
 0x22e   : > { %v788_v0 = vpop.eup %787 }
 0x22f   : > { %506 = vst [vmem:[%s218_s17] sm:$0xff] %v788_v0 }
 0x230   : > { %802 = shalt.err (!%p799_p3)
}
 0x231   : > { %s803_s10 = scalar_lea.hbm %s1035_s30, 128  ;;  %s807_s13 = scalar_lea.hbm %s1082_s5, 256 }
 0x232   : > { %p804_p4 = scmp.ne.s32.totalorder %s1035_s30, %s803_s10  ;;  %p808_p9 = scmp.lt.u32.totalorder %s1035_s30, %s1082_s5 }
 0x233   : > { %p809_p10 = scmp.lt.u32.totalorder %s807_s13, %s803_s10  ;;  %p811_p12 = scmp.lt.u32.totalorder %s803_s10, %s1035_s30 }
 0x234   : > { %p805_p7 = pnand %p804_p4, %p926_p5 }
 0x235   : > { %p810_p11 = por %p809_p10, %p808_p9 }
 0x236   : > { %p806_p8 = pneg %p805_p7 }
 0x237   : > { %p812_p13 = por %p811_p12, %p810_p11 }
 0x239   : > { %p813_p0 = pnand %p812_p13, %p806_p8 }
 0x23b   : > { %816 = shalt.err (!%p813_p0)
}
 0x23c   : > { %740 = dma.vmem_to_hbm [thread:$0]  (%p926_p5), %s1037_s23, 128, %s1035_s30, %s508_s6  }
 0x23d PF: > { %p746_p1 = scmp.ge.s32.totalorder %s851_s21, 2  ;;  %s533_s16 = sand.u32 1, %s839_s18  }
 0x23e   : > { %s534_s17 = scalar_lea.sflag [#allocation3], %s533_s16 }
 0x23f   : > { %p743_p2 = pnand %p746_p1, %p930_p6 }
 0x241   : > { %834 = dma.done.wait (!%p743_p2), %s534_s17, 128  }
 0x242   : > { %836 = vsyncadd (!%p743_p2), %s534_s17, 4294967168  ;;  %p15_p3 = scmp.ge.s32.totalorder %s913_s24, 4   ;;  %s1087_s18 = smov %s843_s19 }
 0x243   : > { %s1088_s19 = smov %s847_s20  ;;  %s1089_s20 = smov %s924_s27 }
 0x244   : > { %s1090_s21 = smov %s913_s24  ;;  %17 = sbr.rel (!%p15_p3) target bundleno = 3 (0x3), region = 75 }
 0x24b   :  { %539 = vsyncpa [#allocation3], 1 }
 0x24c   :  { %541 = vsyncpa [#allocation3 + $0x1], 1 }

</bundles_post_ra>
